<compile_context>
chip_gen: v7x
topology: tpu7x:2x2x1
jax: 0.10.0
libtpu: 0.0.40
codegen_flags: <defaults>
</compile_context>

<pallas_src>
import jax
import jax.numpy as jnp
from jax.experimental import pallas as pl
from jax.experimental.pallas import tpu as pltpu


def _attention_kernel(x_ref, w1_ref, b1_ref, w2_ref, out_ref):
    # x_ref:  (TB, S, D)  batch tile, native dtype (f32 or bf16)
    # w1_ref: (D, H)      first linear weight, pre-transposed, x dtype
    # b1_ref: (1, H)      first linear bias, f32
    # w2_ref: (1, H)      second linear weight as a row, f32
    # out_ref:(TB, 1, D)
    TB, S, D = x_ref.shape
    H = w1_ref.shape[1]

    x = x_ref[...]                                   # (TB, S, D) native dtype
    x2 = x.reshape(TB * S, D)                        # layout-preserving (TB*S sublane-aligned)

    # Exact f32 matmuls for f32 inputs; bf16 inputs take the native single-pass
    # bf16 MXU path (f32 accumulation enforced via preferred_element_type).
    prec = jax.lax.Precision.HIGHEST if x.dtype == jnp.float32 else None

    # hidden = tanh(x @ W1^T + b1)  -> (TB*S, H), f32
    h = jnp.tanh(
        jnp.dot(x2, w1_ref[...], preferred_element_type=jnp.float32, precision=prec)
        + b1_ref[...]
    )

    # scores (H -> 1): VPU multiply + lane reduce (no wasteful N=1 MXU call).
    # b2 is dropped: a constant shift is a no-op under the softmax over S.
    h3 = h.reshape(TB, S, H)
    s = jnp.sum(h3 * w2_ref[...], axis=-1, keepdims=True)       # (TB, S, 1) f32

    # softmax over the sequence axis -- exact division for PyTorch parity.
    m = jnp.max(s, axis=1, keepdims=True)                       # (TB, 1, 1)
    p = jnp.exp(s - m)                                          # (TB, S, 1)
    denom = jnp.sum(p, axis=1, keepdims=True)                   # (TB, 1, 1)
    w = p / denom                                               # (TB, S, 1) f32

    # attended = sum_S w * x as a batched (1,S)@(S,D) MXU matmul with f32
    # accumulation; avoids materializing an f32 copy of a bf16 x tile.
    w_row = w.reshape(TB, 1, S).astype(x.dtype)                 # (TB, 1, S)
    out = jnp.einsum("bqs,bsd->bqd", w_row, x,
                     preferred_element_type=jnp.float32, precision=prec)  # (TB,1,D)
    out_ref[...] = out.astype(out_ref.dtype)


def _vmem_capacity_bytes():
    """Physical VMEM per TensorCore; conservative (v7x) fallback if unknown."""
    try:
        cap = int(getattr(pltpu.get_tpu_info(), "vmem_capacity_bytes", 0))
        if cap > 0:
            return cap
    except Exception:
        pass
    return 64 * 1024 * 1024


def _num_tensorcores():
    """TensorCores per chip (2 on v7x); fall back to 2 so v7x is never starved."""
    try:
        info = pltpu.get_tpu_info()
        for name in ("num_cores", "tensor_cores_per_chip", "cores_per_chip",
                     "num_tensorcores", "core_count"):
            v = getattr(info, name, None)
            if v:
                return int(v)
    except Exception:
        pass
    return 2


def _tile_bytes(tb, S, D, H, x_itemsize):
    """Everything live in VMEM for a batch tile of size tb (double buffers incl.)."""
    x_tile = 2 * tb * S * D * x_itemsize             # double-buffered x block
    weights = 2 * (D * H * x_itemsize + 2 * H * 4)   # w1 (x dtype) + b1/w2 rows (f32)
    h_f32 = tb * S * H * 4                           # tanh activations
    smax = 4 * tb * S * 4                            # scores / exp / weights / row copy
    out = tb * D * 4 + 2 * tb * D * x_itemsize       # f32 matmul result + out block
    return x_tile + weights + h_f32 + smax + out


def _pick_batch_tile(B, S, D, H, x_itemsize, budget_bytes, n_cores):
    """Largest divisor of B whose working set fits the VMEM budget, preferring
    (a) sublane-aligned TB*S (free reshapes) and (b) a grid-step count that is a
    multiple of the TensorCore count (keeps both v7x cores busy)."""
    cands = [t for t in range(1, B + 1)
             if B % t == 0 and _tile_bytes(t, S, D, H, x_itemsize) <= budget_bytes]
    if not cands:
        cands = [1]
    sublane_rows = max(1, 32 // x_itemsize)          # 8 rows (f32) / 16 rows (bf16)
    aligned = [t for t in cands if (t * S) % sublane_rows == 0]
    if aligned:
        cands = aligned
    if n_cores > 1:
        balanced = [t for t in cands if (B // t) % n_cores == 0]
        if balanced:
            cands = balanced
    return max(cands)


def attention_layer(x, w1, b1, w2, b2=None):
    """x: (B, S, D) (native dtype); w1: (H, D); b1: (H,); w2: (1, H); b2 unused
    (a constant shift before the seq-axis softmax is mathematically a no-op)."""
    del b2
    B, S, D = x.shape
    H = w1.shape[0]

    # Keep w1 in x's dtype so a bf16 x takes the native bf16 MXU path.
    w1t = jnp.asarray(w1).astype(x.dtype).T               # (D, H)
    b1r = jnp.asarray(b1, jnp.float32).reshape(1, H)      # (1, H) f32
    w2r = jnp.asarray(w2, jnp.float32).reshape(1, H)      # (1, H) f32

    itemsize = x.dtype.itemsize
    vmem_cap = _vmem_capacity_bytes()
    budget = vmem_cap // 2                                 # headroom for compiler scratch
    TB = _pick_batch_tile(B, S, D, H, itemsize, budget, _num_tensorcores())
    vmem_limit = int(min(vmem_cap * 0.9,
                         max(32 * 1024 * 1024,
                             1.5 * _tile_bytes(TB, S, D, H, itemsize))))

    # TODO(synk): if S is not a multiple of 8 (f32) / 16 (bf16), pad S and mask
    # padded scores to -inf before the softmax (full-S blocks assumed here).
    # TODO(synk): for very long S, tile the sequence with an online softmax.
    # TODO(synk): on v7x, single-buffer the weight BlockSpecs (constant index_map).
    out3 = pl.pallas_call(
        _attention_kernel,
        out_shape=jax.ShapeDtypeStruct((B, 1, D), x.dtype),
        grid_spec=pltpu.PrefetchScalarGridSpec(
            num_scalar_prefetch=0,
            grid=(B // TB,),
            in_specs=[
                pl.BlockSpec((TB, S, D), lambda b: (b, 0, 0)),
                pl.BlockSpec((D, H), lambda b: (0, 0)),
                pl.BlockSpec((1, H), lambda b: (0, 0)),
                pl.BlockSpec((1, H), lambda b: (0, 0)),
            ],
            out_specs=pl.BlockSpec((TB, 1, D), lambda b: (b, 0, 0)),
        ),
        compiler_params=pltpu.CompilerParams(
            dimension_semantics=("parallel",),
            vmem_limit_bytes=vmem_limit,
        ),
    )(x, w1t, b1r, w2r)
    return out3.reshape(B, D)


def attention_layer_ref(x, w1, b1, w2, b2):
    """Plain-JAX reference mirroring the PyTorch forward (keeps b2), with
    full-precision matmuls so the comparison is meaningful on TPU."""
    h = jnp.tanh(jnp.einsum("bsd,hd->bsh", x, w1, precision="highest") + b1)  # (B,S,H)
    s = jnp.einsum("bsh,oh->bso", h, w2, precision="highest") + b2            # (B,S,1)
    w = jax.nn.softmax(s, axis=1)                                             # softmax over seq
    return jnp.sum(w * x, axis=1)                                             # (B,D)


if __name__ == "__main__":
    # Small shapes consistent with the module: x is (B, S, input_dim)
    B, S, D = 2, 8, 32
    H = D // 2

    key = jax.random.PRNGKey(0)
    kx, kw1, kb1, kw2, kb2 = jax.random.split(key, 5)

    x = jax.random.normal(kx, (B, S, D), dtype=jnp.float32)

    # Deterministic init mimicking nn.Linear default (uniform +/- 1/sqrt(fan_in))
    bound1 = 1.0 / jnp.sqrt(D)
    w1 = jax.random.uniform(kw1, (H, D), minval=-bound1, maxval=bound1, dtype=jnp.float32)
    b1 = jax.random.uniform(kb1, (H,), minval=-bound1, maxval=bound1, dtype=jnp.float32)
    bound2 = 1.0 / jnp.sqrt(H)
    w2 = jax.random.uniform(kw2, (1, H), minval=-bound2, maxval=bound2, dtype=jnp.float32)
    b2 = jax.random.uniform(kb2, (1,), minval=-bound2, maxval=bound2, dtype=jnp.float32)

    # f32 path (small batch)
    out = jax.block_until_ready(attention_layer(x, w1, b1, w2, b2))
    ref = attention_layer_ref(x, w1, b1, w2, b2)
    assert out.shape == (B, D)
    assert jnp.allclose(out, ref, atol=2e-3, rtol=2e-3), "f32 mismatch vs reference"

    # larger batch exercises TB > 1 (batch-tiled grid, (TB*S, D) MXU matmul)
    B2 = 8
    x_big = jax.random.normal(jax.random.PRNGKey(1), (B2, S, D), dtype=jnp.float32)
    out_big = jax.block_until_ready(attention_layer(x_big, w1, b1, w2, b2))
    ref_big = attention_layer_ref(x_big, w1, b1, w2, b2)
    assert out_big.shape == (B2, D)
    assert jnp.allclose(out_big, ref_big, atol=2e-3, rtol=2e-3), "batched mismatch vs reference"

    # bf16 input path: x and w1 stay bf16 through DMA/MXU (f32 accumulation)
    x_bf16 = x_big.astype(jnp.bfloat16)
    out_bf16 = jax.block_until_ready(attention_layer(x_bf16, w1, b1, w2, b2))
    ref_bf16 = attention_layer_ref(x_bf16.astype(jnp.float32), w1, b1, w2, b2)
    assert out_bf16.shape == (B2, D)
    assert jnp.allclose(out_bf16.astype(jnp.float32), ref_bf16, atol=5e-2, rtol=5e-2), \
        "bf16 mismatch vs reference"

    print("KERNEL_OK")
</pallas_src>

<mosaic_0001>
module attributes {stable_mosaic.version = 11 : i64} {
  func.func @_attention_kernel(%arg0: i32, %arg1: memref<1x8x32xf32, #tpu.memory_space<vmem>>, %arg2: memref<32x16xf32, #tpu.memory_space<vmem>>, %arg3: memref<1x16xf32, #tpu.memory_space<vmem>>, %arg4: memref<1x16xf32, #tpu.memory_space<vmem>>, %arg5: memref<1x1x32xf32, #tpu.memory_space<vmem>>) attributes {dimension_semantics = [#tpu.dimension_semantics<parallel>], iteration_bounds = array<i64: 2>, scalar_prefetch = 0 : i64, scratch_operands = 0 : i64, tpu.core_type = #tpu.core_type<tc>, window_params = [{transform_indices = @transform_0, window_bounds = array<i64: 1, 8, 32>}, {pipeline_mode = #tpu.pipeline_mode<synchronous>, transform_indices = @transform_1, window_bounds = array<i64: 32, 16>}, {pipeline_mode = #tpu.pipeline_mode<synchronous>, transform_indices = @transform_2, window_bounds = array<i64: 1, 16>}, {pipeline_mode = #tpu.pipeline_mode<synchronous>, transform_indices = @transform_3, window_bounds = array<i64: 1, 16>}, {transform_indices = @transform_4, window_bounds = array<i64: 1, 1, 32>}]} {
    %c0 = arith.constant 0 : index
    %c0_0 = arith.constant 0 : index
    %c0_1 = arith.constant 0 : index
    %0 = vector.load %arg1[%c0, %c0_0, %c0_1] : memref<1x8x32xf32, #tpu.memory_space<vmem>>, vector<1x8x32xf32>
    %1 = vector.shape_cast %0 : vector<1x8x32xf32> to vector<8x32xf32>
    %c0_2 = arith.constant 0 : index
    %c0_3 = arith.constant 0 : index
    %2 = vector.load %arg2[%c0_2, %c0_3] : memref<32x16xf32, #tpu.memory_space<vmem>>, vector<32x16xf32>
    %cst = arith.constant dense<0.000000e+00> : vector<8x16xf32>
    %3 = tpu.matmul %1, %2, %cst {dimension_numbers = #tpu.dot_dimension_numbers<[1], [0], [0], [1], [0, 0, 1, 1], [], []>, precision = #tpu.contract_precision<fp32>} : vector<8x32xf32>, vector<32x16xf32>, vector<8x16xf32> -> vector<8x16xf32>
    %c0_4 = arith.constant 0 : index
    %c0_5 = arith.constant 0 : index
    %4 = vector.load %arg3[%c0_4, %c0_5] : memref<1x16xf32, #tpu.memory_space<vmem>>, vector<1x16xf32>
    %5 = vector.broadcast %4 : vector<1x16xf32> to vector<8x16xf32>
    %6 = arith.addf %3, %5 : vector<8x16xf32>
    %7 = math.tanh %6 : vector<8x16xf32>
    %8 = vector.shape_cast %7 : vector<8x16xf32> to vector<1x8x16xf32>
    %c0_6 = arith.constant 0 : index
    %c0_7 = arith.constant 0 : index
    %9 = vector.load %arg4[%c0_6, %c0_7] : memref<1x16xf32, #tpu.memory_space<vmem>>, vector<1x16xf32>
    %10 = vector.shape_cast %9 : vector<1x16xf32> to vector<1x1x16xf32>
    %11 = vector.broadcast %10 : vector<1x1x16xf32> to vector<1x8x16xf32>
    %12 = arith.mulf %8, %11 : vector<1x8x16xf32>
    %cst_8 = arith.constant dense<0.000000e+00> : vector<1x8xf32>
    %13 = vector.multi_reduction <add>, %12, %cst_8 [2] : vector<1x8x16xf32> to vector<1x8xf32>
    %14 = vector.shape_cast %13 : vector<1x8xf32> to vector<1x8x1xf32>
    %cst_9 = arith.constant dense<0xFF800000> : vector<1x1xf32>
    %15 = vector.multi_reduction <maximumf>, %14, %cst_9 [1] : vector<1x8x1xf32> to vector<1x1xf32>
    %16 = vector.shape_cast %15 : vector<1x1xf32> to vector<1x1x1xf32>
    %17 = vector.broadcast %16 : vector<1x1x1xf32> to vector<1x8x1xf32>
    %18 = arith.subf %14, %17 : vector<1x8x1xf32>
    %19 = math.exp %18 : vector<1x8x1xf32>
    %cst_10 = arith.constant dense<0.000000e+00> : vector<1x1xf32>
    %20 = vector.multi_reduction <add>, %19, %cst_10 [1] : vector<1x8x1xf32> to vector<1x1xf32>
    %21 = vector.shape_cast %20 : vector<1x1xf32> to vector<1x1x1xf32>
    %22 = vector.broadcast %21 : vector<1x1x1xf32> to vector<1x8x1xf32>
    %23 = arith.divf %19, %22 : vector<1x8x1xf32>
    %24 = vector.shape_cast %23 : vector<1x8x1xf32> to vector<1x1x8xf32>
    "tpu.trace_start"() <{level = 10 : i32, message = "bqs,bsd->bqd"}> : () -> ()
    %cst_11 = arith.constant dense<0.000000e+00> : vector<1x1x32xf32>
    %25 = tpu.matmul %24, %0, %cst_11 {dimension_numbers = #tpu.dot_dimension_numbers<[2], [1], [1], [2], [0, 0, 0, 1, 1, 2], [0], [0]>, precision = #tpu.contract_precision<fp32>} : vector<1x1x8xf32>, vector<1x8x32xf32>, vector<1x1x32xf32> -> vector<1x1x32xf32>
    "tpu.trace_stop"() : () -> ()
    %c0_12 = arith.constant 0 : index
    %c0_13 = arith.constant 0 : index
    %c0_14 = arith.constant 0 : index
    %26 = vector.load %arg5[%c0_12, %c0_13, %c0_14] : memref<1x1x32xf32, #tpu.memory_space<vmem>>, vector<1x1x32xf32>
    tpu.vector_store %arg5[%c0_12, %c0_13, %c0_14], %25 {strides = array<i32>} : memref<1x1x32xf32, #tpu.memory_space<vmem>>, vector<1x1x32xf32>,
    return
  }
  func.func @transform_0(%arg0: i32) -> (i32, i32, i32) {
    %c0_i32 = arith.constant 0 : i32
    %c0_i32_0 = arith.constant 0 : i32
    %c0_i32_1 = arith.constant 0 : i32
    return %arg0, %c0_i32, %c0_i32_0 : i32, i32, i32
  }
  func.func @transform_1(%arg0: i32) -> (i32, i32) {
    %c0_i32 = arith.constant 0 : i32
    %c0_i32_0 = arith.constant 0 : i32
    %c0_i32_1 = arith.constant 0 : i32
    return %c0_i32, %c0_i32_0 : i32, i32
  }
  func.func @transform_2(%arg0: i32) -> (i32, i32) {
    %c0_i32 = arith.constant 0 : i32
    %c0_i32_0 = arith.constant 0 : i32
    %c0_i32_1 = arith.constant 0 : i32
    return %c0_i32, %c0_i32_0 : i32, i32
  }
  func.func @transform_3(%arg0: i32) -> (i32, i32) {
    %c0_i32 = arith.constant 0 : i32
    %c0_i32_0 = arith.constant 0 : i32
    %c0_i32_1 = arith.constant 0 : i32
    return %c0_i32, %c0_i32_0 : i32, i32
  }
  func.func @transform_4(%arg0: i32) -> (i32, i32, i32) {
    %c0_i32 = arith.constant 0 : i32
    %c0_i32_0 = arith.constant 0 : i32
    %c0_i32_1 = arith.constant 0 : i32
    return %arg0, %c0_i32, %c0_i32_0 : i32, i32, i32
  }
}

</mosaic_0001>

<bundles_post_ra>
// kernel: tpu_custom_call.1
= control target key start
LH: loop header
LB: loop body
LE: loop exit
PB: predicated region body
PF: predicated region fallthrough
CT: control target
= control target key end

     0   :  { %9 = vsyncpa [#allocation3], 0  ;;  %s1759_s0 = inlined_call_operand.vmem [shape: f32[2,8,32], index: 0, kind: input, shape index: {}]   ;;  %s1760_s1 = inlined_call_operand.vmem [shape: f32[32,16], index: 1, kind: input, shape index: {}]   ;;  %s1761_s2 = inlined_call_operand.vmem [shape: f32[1,16], index: 2, kind: input, shape index: {}]   ;;  %s1762_s3 = inlined_call_operand.vmem [shape: f32[1,16], index: 3, kind: input, shape index: {}]   ;;  %s1763_s4 = inlined_call_operand.hbm [shape: f32[2,1,32], index: 4, kind: output, shape index: {}]  }
   0x1   :  { %11 = vsyncpa [#allocation3 + $0x1], 0  ;;  %s1594_s15 = smov 0   ;;  %s1596_s16 = smov 0  }
   0x2   :  { %s1598_s17 = smov 0   ;;  %s1600_s18 = smov 0  }
   0x3 LB: > { %s1615_s19 = sadd.s32 4294967295, %s1563_s18   ;;  %s1249_s20 = sadd.s32 4294967294, %s1563_s18   ;;  %s1563_s18 = sphi %s1600_s18, %s1769_s18   ;;  %s1559_s17 = sphi %s1598_s17, %s1768_s17   ;;  %s1555_s16 = sphi %s1596_s16, %s1767_s16   ;;  %s1551_s15 = sphi %s1594_s15, %s1766_s15  }
   0x4   : > { %s1619_s21 = sadd.s32 1, %s1563_s18   ;;  %s113_s22 = sadd.s32 1, %s1559_s17 }
   0x5   : > { %s110_s23 = ssub.s32 %s1563_s18, %s1619_s21  ;;  %p123_p0 = scmp.ne.s32.totalorder %s1559_s17, %s1555_s16 }
   0x6   : > { %p111_p1 = scmp.eq.s32.totalorder %s110_s23, 0  ;;  %p124_p2 = scmp.eq.s32.totalorder %s1615_s19, 1 }
   0x7   : > { %p129_p3 = scmp.ne.s32.totalorder %s1555_s16, %s1551_s15  ;;  %p130_p4 = scmp.eq.s32.totalorder %s1249_s20, 1 }
   0x8   : > { %s1630_s24 = scalar_select %p111_p1, %s1559_s17, %s113_s22  }
   0x9   : > { %p1632_p5 = por %p124_p2, %p123_p0  ;;  %p1636_p6 = por %p130_p4, %p129_p3 }
   0xa   : > { %p1252_p7 = scmp.ge.s32.totalorder %s1563_s18, 1  ;;  %p164_p8 = scmp.lt.s32.totalorder %s1563_s18, 3 }
   0xc   : > { %p165_p9 = pnand %p1252_p7, %p164_p8 }
   0xd   : > { %v193_v0 = vld [vmem:[%s1760_s1] sm:$0xff] (!%p165_p9)  ;;  %v194_v1 = vld [vmem:[%s1760_s1 + $0x8] sm:$0xff] (!%p165_p9)  ;;  %v195_v2 = vld [vmem:[%s1760_s1 + $0x10] sm:$0xff] (!%p165_p9)  ;;  %v1565_v3 = vmov (!%p165_p9), 0.0|0.0   ;;  %vm1566_vm0 = vmmov (!%p165_p9), 0   ;;  %v1567_v8 = vmov (!%p165_p9), 0.0  }
   0xe   : > { %168 = sbr.rel (%p165_p9) target bundleno = 766 (0x2fe), region = 36  ;;  %1403 = vmatprep.subr.bf16.mxu0 (!%p165_p9), %v1565_v3  ;;  %v209_v4 = vand.u32 (!%p165_p9), 4294901760, %v193_v0  ;;  %v212_v5 = vand.u32 (!%p165_p9), 4294901760, %v194_v1  ;;  %v196_v6 = vld [vmem:[%s1760_s1 + $0x18] sm:$0xff] (!%p165_p9)  ;;  %v215_v7 = vand.u32 (!%p165_p9), 4294901760, %v195_v2  ;;  %1320 = vmatprep.mubr.msk.f32.mxu0 (!%p165_p9), %vm1566_vm0, %v1567_v8  ;;  %p188_p10 = scmp.lt.s32.totalorder (!%p165_p9), %s1615_s19, 1 }
   0xf   : > { %v218_v9 = vand.u32 (!%p165_p9), 4294901760, %v196_v6  ;;  %1397 = vmatprep.subr.bf16.mxu1 (!%p165_p9), %v1565_v3  ;;  %1309 = vmatprep.mubr.msk.f32.mxu1 (!%p165_p9), %vm1566_vm0, %v1567_v8  ;;  %vm204_vm1 = vcmask (!%p165_p9), 261120   ;;  %v1254_v43 = vld [vmem:[%s1761_s2] ss:$0 sm:$0xff] (!%p165_p9)  ;;  %vm702_vm2 = vcmask (!%p165_p9), 130048   ;;  %vm730_vm3 = vcmask (!%p165_p9), 64512  }
  0x10   : > { %v289_v10 = vsub.f32 (!%p165_p9), %v193_v0, %v209_v4  ;;  %v296_v11 = vsub.f32 (!%p165_p9), %v194_v1, %v212_v5  ;;  %v303_v12 = vsub.f32 (!%p165_p9), %v195_v2, %v215_v7  ;;  %v1398_v13 = vpack.c.bf16 (!%p165_p9), %v212_v5, %v209_v4  ;;  %v1255_v48 = vld [vmem:[%s1762_s3] ss:$0 sm:$0xff] (!%p165_p9)  ;;  %s186_s27 = sand.u32 (!%p165_p9), 1, %s1555_s16   ;;  %s1256_s28 = sshll.u32 (!%p165_p9), %s1615_s19, 4 }
  0x11   : > { %v310_v14 = vsub.f32 (!%p165_p9), %v196_v6, %v218_v9  ;;  %v1401_v23 = vpack.c.bf16 (!%p165_p9), %v218_v9, %v215_v7  ;;  %v724_v5 = vlaneseq (!%p165_p9)  ;;  %s187_s29 = scalar_lea.vmem (!%p165_p9), [#allocation2], %s186_s27  ;;  %vm1179_vm4 = vcmask (!%p165_p9), 253952   ;;  %s1717_s7 = scalar_lea.hbm (!%p165_p9), %s1763_s4, %s1256_s28 }
  0x12   : > { %v290_v15 = vand.u32 (!%p165_p9), 4294901760, %v289_v10  ;;  %v297_v16 = vand.u32 (!%p165_p9), 4294901760, %v296_v11  ;;  %v304_v17 = vand.u32 (!%p165_p9), 4294901760, %v303_v12  ;;  %1399 = vmatpush3.bf16.msra.mxu1 (!%p165_p9), %v1398_v13  ;;  %v1410_v36 = vpack.c.bf16 (!%p165_p9), %v296_v11, %v289_v10  ;;  %s1194_s30 = sshll.u32 (!%p165_p9), %s187_s29, 4  ;;  %s1182_s8 = scalar_lea.sflag (!%p165_p9), [#allocation3], %s186_s27  ;;  %s1719_s30 = int_to_ptr.vmem [resolvable:$true] %s1194_s30 }
  0x13   : > { %v311_v18 = vand.u32 (!%p165_p9), 4294901760, %v310_v14  ;;  %1400 = vmatprep.subr.bf16.mxu1 (!%p165_p9), %v1565_v3  ;;  %v1413_v38 = vpack.c.bf16 (!%p165_p9), %v310_v14, %v303_v12  ;;  %v725_v6 = vand.u32 (!%p165_p9), 127, %v724_v5  ;;  %v727_v7 = vshrl.u32 (!%p165_p9), %v724_v5, 7 }
  0x14   : > { %v291_v19 = vsub.f32 (!%p165_p9), %v289_v10, %v290_v15  ;;  %v298_v20 = vsub.f32 (!%p165_p9), %v296_v11, %v297_v16  ;;  %v305_v21 = vsub.f32 (!%p165_p9), %v303_v12, %v304_v17  ;;  %v1422_v39 = vpack.c.bf16 (!%p165_p9), %v297_v16, %v290_v15 }
  0x15   : > { %s189_s9 = scalar_select %p188_p10, %s1615_s19, 1  ;;  %v312_v24 = vsub.f32 %v310_v14, %v311_v18  ;;  %v1425_v40 = vpack.c.bf16 %v311_v18, %v304_v17  ;;  %v728_v9 = vsub.s32 %v725_v6, %v727_v7 }
  0x16   : > { %v292_v26 = vand.u32 4294901760, %v291_v19  ;;  %v299_v27 = vand.u32 4294901760, %v298_v20  ;;  %v306_v28 = vand.u32 4294901760, %v305_v21  ;;  %1402 = vmatpush3.bf16.msra.mxu1 %v1401_v23  ;;  %s1568_s19 = smov [#allocation2]  }
  0x17   : > { %s1253_s10 = sshll.u32 %s189_s9, 3  ;;  %v313_v30 = vand.u32 4294901760, %v312_v24  ;;  %1367 = vmatprep.subr.mxu1 %v1567_v8  ;;  %s1501_s9 = scalar_lea.vmem %s1719_s30, 16 }
  0x18   : > { %s191_s13 = scalar_lea.vmem %s1759_s0, %s1253_s10  ;;  %v1404_v31 = vpack.c.bf16 %v299_v27, %v292_v26  ;;  %p1502_p11 = scmp.ne.s32.totalorder %s1719_s30, %s1501_s9 }
  0x19   : > { %v1666_v22 = vld [vmem:[%s191_s13] sm:$0xff]  ;;  %v1407_v33 = vpack.c.bf16 %v313_v30, %v306_v28  ;;  %s1505_s10 = sshll.u32 %s1568_s19, 4  ;;  %s1506_s10 = int_to_ptr.vmem [resolvable:$false] %s1505_s10 }
  0x1a   : > { %v206_v25 = vsel %vm204_vm1, %v1666_v22, 0  ;;  %1405 = vmatpush3.bf16.msra.mxu0 %v1404_v31  ;;  %v734_v52 = vand.u32 4294901760, %v1666_v22  ;;  %p1503_p12 = pnand %p1502_p11, %p1632_p5  ;;  %s1507_s11 = scalar_lea.vmem %s1506_s10, 32 }
  0x1b   : > { %v277_v29 = vand.u32 4294901760, %v206_v25  ;;  %1406 = vmatprep.subr.bf16.mxu0 %v1565_v3  ;;  %p1508_p0 = scmp.lt.s32.totalorder %s1719_s30, %s1506_s10  ;;  %p1509_p1 = scmp.lt.s32.totalorder %s1507_s11, %s1501_s9 }
  0x1c   : > { %v811_v12 = vsub.f32 %v1666_v22, %v734_v52  ;;  %p1504_p13 = pneg %p1503_p12 }
  0x1d   : > { %v278_v32 = vsub.f32 %v206_v25, %v277_v29  ;;  %p1510_p2 = por %p1509_p1, %p1508_p0 }
  0x1e   : > { %1408 = vmatpush3.bf16.msra.mxu0 %v1407_v33  ;;  %v812_v15 = vand.u32 4294901760, %v811_v12 }
  0x1f   : > { %v279_v34 = vand.u32 4294901760, %v278_v32  ;;  %1409 = vmatprep.subr.bf16.mxu0 %v1565_v3  ;;  %p1511_p3 = pnand %p1510_p2, %p1504_p13 }
  0x20   : > { %v813_v18 = vsub.f32 %v811_v12, %v812_v15 }
  0x21   : > { %v280_v35 = vsub.f32 %v278_v32, %v279_v34  ;;  %1321 = vmatmul.mubr.f32.vlgmr.msra.gmra.mrb[0].mxu0 %v277_v29 }
  0x22   : > { %1411 = vmatpush3.bf16.msra.mxu0 %v1410_v36  ;;  %1331 = vmatprep.mubr.msk.f32.mxu0 %vm1566_vm0, %v1567_v8  ;;  %v814_v21 = vand.u32 4294901760, %v813_v18 }
  0x23   : > { %v281_v37 = vand.u32 4294901760, %v280_v35  ;;  %1412 = vmatprep.subr.bf16.mxu0 %v1565_v3 }
  0x25   : > { %1310 = vmatmul.mubr.f32.vlgmr.msra.gmra.mrb[0].mxu1 %v281_v37 }
  0x26   : > { %1369 = vmatprep.mubr.msk.f32.mxu1 %vm1566_vm0, %v1567_v8  ;;  %1414 = vmatpush3.bf16.msra.mxu0 %v1413_v38 }
  0x27   : > { %1415 = vmatprep.subr.bf16.mxu0 %v1565_v3  ;;  %1368 = vmatpush3.msra.mxu1 %v734_v52 }
  0x28   : > { %1372 = vmatprep.subr.mxu1 %v1567_v8 }
  0x29   : > { %1332 = vmatmul.mubr.f32.vlgmr.msra.gmra.mrb[0].mxu0 %v278_v32 }
  0x2a   : > { %1417 = vmatpush3.bf16.msra.mxu0 %v1398_v13  ;;  %1342 = vmatprep.mubr.msk.f32.mxu0 %vm1566_vm0, %v1567_v8 }
  0x2b   : > { %1418 = vmatprep.subr.bf16.mxu0 %v1565_v3 }
  0x2e   : > { %1420 = vmatpush3.bf16.msra.mxu0 %v1401_v23 }
  0x2f   : > { %1421 = vmatprep.subr.bf16.mxu0 %v1565_v3 }
  0x31   : > { %1343 = vmatmul.mubr.f32.vlgmr.msra.gmra.mrb[0].mxu0 %v279_v34 }
  0x32   : > { %1423 = vmatpush3.bf16.msra.mxu0 %v1422_v39  ;;  %1353 = vmatprep.mubr.msk.f32.mxu0 %vm1566_vm0, %v1567_v8 }
  0x33   : > { %1424 = vmatprep.subr.bf16.mxu0 %v1565_v3 }
  0x36   : > { %1426 = vmatpush3.bf16.msra.mxu0 %v1425_v40 }
  0x37   : > { %1427 = vmatprep.subr.bf16.mxu0 %v1565_v3 }
  0x39   : > { %1354 = vmatmul.mubr.f32.vlgmr.msra.gmra.mrb[0].mxu0 %v277_v29 }
  0x3a   : > { %1429 = vmatpush3.bf16.msra.mxu0 %v1398_v13  ;;  %1364 = vmatprep.mubr.msk.f32.mxu0 %vm1566_vm0, %v1567_v8 }
  0x3b   : > { %1430 = vmatprep.subr.bf16.mxu0 %v1565_v3 }
  0x3e   : > { %1432 = vmatpush3.bf16.msra.mxu0 %v1401_v23 }
  0x41   : > { %1365 = vmatmul.mubr.f32.vlgmr.msra.gmra.mrb[0].mxu0 %v277_v29 }
  0xf8   : > { %v283_v41 = vpop.f32.mrb[0].mxu1 }
  0xf9   : > { %v1311_v42 = vpop.f32.mrb[1].mxu1  ;;  %v284_v44 = vadd.f32 %v1254_v43, %v283_v41 }
 0x114   : > { %v689_v45 = vpop.f32.mrb[0].mxu0 }
 0x115   : > { %v1434_v46 = vadd.f32 %v689_v45, %v284_v44  ;;  %v1366_v47 = vpop.f32.mrb[1].mxu0 }
 0x117   : > { %1495 = vtanh.f32 %v1434_v46 }
 0x121   : > { %v1496_v49 = vpop.eup %1495 }
 0x122   : > { %v701_v50 = vmul.f32 %v1496_v49, %v1255_v48 }
 0x124   : > { %v703_v51 = vsel %vm702_vm2, %v701_v50, 0.0 }
 0x125   : > { %704 = vadd.xlane.f32.xlu0 %v703_v51 }
 0x1b2   : > { %v705_v53 = vpop.xlane.xlu0 %704 }
 0x1b3   : > { %v706_v54 = vrot.slane %v705_v53, 4 }
 0x1b5   : > { %v707_v55 = vmax.f32 %v705_v53, %v706_v54 }
 0x1b7   : > { %v708_v56 = vrot.slane %v707_v55, 2 }
 0x1b9   : > { %v709_v57 = vmax.f32 %v707_v55, %v708_v56 }
 0x1bb   : > { %v710_v58 = vrot.slane %v709_v57, 1 }
 0x1bd   : > { %v711_v59 = vmax.f32 %v709_v57, %v710_v58 }
 0x1bf   : > { %v712_v60 = vsub.f32 %v705_v53, %v711_v59 }
 0x1c1   : > { %v713_v61 = vmul.f32 1.442695, %v712_v60 }
 0x1c3   : > { %1497 = vpow2.f32 %v713_v61 }
 0x1cd   : > { %v1498_v62 = vpop.eup %1497 }
 0x1ce   : > { %v715_v63 = vrot.slane %v1498_v62, 4 }
 0x1d0   : > { %v716_v0 = vadd.f32 %v1498_v62, %v715_v63 }
 0x1d2   : > { %v717_v1 = vrot.slane %v716_v0, 2 }
 0x1d4   : > { %v718_v2 = vadd.f32 %v717_v1, %v716_v0 }
 0x1d6   : > { %v719_v3 = vrot.slane %v718_v2, 1 }
 0x1d8   : > { %v720_v4 = vadd.f32 %v719_v3, %v718_v2 }
 0x1da   : > { %1499 = vrcp.f32 %v720_v4 }
 0x1e4   : > { %v1500_v10 = vpop.eup %1499 }
 0x1e5   : > { %v722_v11 = vmul.f32 %v1500_v10, %v1498_v62 }
 0x1e7   : > { %v729_v13 = vrot.slane %v722_v11, %v728_v9 }
 0x1e9   : > { %v731_v14 = vsel %vm730_vm3, %v729_v13, 0 }
 0x1ea   : > { %v799_v16 = vand.u32 4294901760, %v731_v14 }
 0x1ec   : > { %v800_v17 = vsub.f32 %v731_v14, %v799_v16 }
 0x1ee   : > { %v801_v19 = vand.u32 4294901760, %v800_v17 }
 0x1f0   : > { %v802_v20 = vsub.f32 %v800_v17, %v801_v19 }
 0x1f2   : > { %v803_v23 = vand.u32 4294901760, %v802_v20 }
 0x1f4   : > { %1370 = vmatmul.mubr.f32.vlgmr.msra.gmra.mrb[2].mxu1 %v803_v23 }
 0x1f5   : > { %1373 = vmatpush3.msra.mxu1 %v814_v21  ;;  %1374 = vmatprep.mubr.msk.f32.mxu1 %vm1566_vm0, %v1567_v8 }
 0x1f6   : > { %1377 = vmatprep.subr.mxu1 %v1567_v8 }
 0x1fc   : > { %1375 = vmatmul.mubr.f32.vlgmr.msra.gmra.mrb[2].mxu1 %v799_v16 }
 0x1fd   : > { %1378 = vmatpush3.msra.mxu1 %v811_v12  ;;  %1379 = vmatprep.mubr.msk.f32.mxu1 %vm1566_vm0, %v1567_v8 }
 0x1fe   : > { %1382 = vmatprep.subr.mxu1 %v1567_v8 }
 0x204   : > { %1380 = vmatmul.mubr.f32.vlgmr.msra.gmra.mrb[2].mxu1 %v800_v17 }
 0x205   : > { %1383 = vmatpush3.msra.mxu1 %v734_v52  ;;  %1384 = vmatprep.mubr.msk.f32.mxu1 %vm1566_vm0, %v1567_v8 }
 0x206   : > { %1387 = vmatprep.subr.mxu1 %v1567_v8 }
 0x20c   : > { %1385 = vmatmul.mubr.f32.vlgmr.msra.gmra.mrb[2].mxu1 %v801_v19 }
 0x20d   : > { %1388 = vmatpush3.msra.mxu1 %v812_v15  ;;  %1389 = vmatprep.mubr.msk.f32.mxu1 %vm1566_vm0, %v1567_v8 }
 0x20e   : > { %1392 = vmatprep.subr.mxu1 %v1567_v8 }
 0x214   : > { %1390 = vmatmul.mubr.f32.vlgmr.msra.gmra.mrb[2].mxu1 %v799_v16 }
 0x215   : > { %1393 = vmatpush3.msra.mxu1 %v734_v52  ;;  %1394 = vmatprep.mubr.msk.f32.mxu1 %vm1566_vm0, %v1567_v8 }
 0x21c   : > { %1395 = vmatmul.mubr.f32.vlgmr.msra.gmra.mrb[2].mxu1 %v799_v16 }
 0x2ef   : > { %v1175_v22 = vpop.f32.mrb[2].mxu1 }
 0x2f0   : > { %1180 = vst.msk [vmem:[%s187_s29] sm:$0x1] %vm1179_vm4, %v1175_v22  ;;  %v1396_v24 = vpop.f32.mrb[3].mxu1 }
 0x2f1   : > { %1514 = shalt.err (!%p1511_p3)
}
 0x2f2   : > { %s1515_s12 = scalar_lea.hbm %s1717_s7, 16  ;;  %s1519_s20 = scalar_lea.hbm %s1763_s4, 32 }
 0x2f3   : > { %p1516_p4 = scmp.ne.s32.totalorder %s1717_s7, %s1515_s12  ;;  %p1520_p9 = scmp.lt.u32.totalorder %s1717_s7, %s1763_s4 }
 0x2f4   : > { %p1521_p10 = scmp.lt.u32.totalorder %s1519_s20, %s1515_s12  ;;  %p1523_p12 = scmp.lt.u32.totalorder %s1515_s12, %s1717_s7 }
 0x2f5   : > { %p1517_p7 = pnand %p1516_p4, %p1632_p5 }
 0x2f6   : > { %p1522_p11 = por %p1521_p10, %p1520_p9 }
 0x2f7   : > { %p1518_p8 = pneg %p1517_p7 }
 0x2f8   : > { %p1524_p13 = por %p1523_p12, %p1522_p11 }
 0x2fa   : > { %p1525_p0 = pnand %p1524_p13, %p1518_p8 }
 0x2fc   : > { %1528 = shalt.err (!%p1525_p0)
}
 0x2fd   : > { %1453 = dma.vmem_to_hbm [thread:$0]  (%p1632_p5), %s1719_s30, 16, %s1717_s7, %s1182_s8  }
 0x2fe PF: > { %p1459_p1 = scmp.ge.s32.totalorder %s1563_s18, 2  ;;  %s1206_s27 = sand.u32 1, %s1551_s15  }
 0x2ff   : > { %s1207_s28 = scalar_lea.sflag [#allocation3], %s1206_s27 }
 0x300   : > { %p1456_p2 = pnand %p1459_p1, %p1636_p6 }
 0x302   : > { %1546 = dma.done.wait (!%p1456_p2), %s1207_s28, 16  }
 0x303   : > { %1548 = vsyncadd (!%p1456_p2), %s1207_s28, 4294967280  ;;  %p14_p3 = scmp.ge.s32.totalorder %s1619_s21, 4   ;;  %s1766_s15 = smov %s1555_s16 }
 0x304   : > { %s1767_s16 = smov %s1559_s17  ;;  %s1768_s17 = smov %s1630_s24 }
 0x305   : > { %s1769_s18 = smov %s1619_s21  ;;  %16 = sbr.rel (!%p14_p3) target bundleno = 3 (0x3), region = 71 }
 0x30c   :  { %1211 = vsyncpa [#allocation3], 1 }
 0x30d   :  { %1213 = vsyncpa [#allocation3 + $0x1], 1 }

</bundles_post_ra>
